<compile_context>
chip_gen: v7x
topology: tpu7x:2x2x1
jax: 0.10.0
libtpu: 0.0.40
codegen_flags: <defaults>
</compile_context>

<pallas_src>
import functools
import math

import jax
import jax.numpy as jnp
from jax import lax
from jax.experimental import pallas as pl
from jax.experimental.pallas import tpu as pltpu

_LANES = 128


def _vmem_capacity_bytes():
    try:
        cap = int(getattr(pltpu.get_tpu_info(), "vmem_capacity_bytes", 0) or 0)
        if cap > 0:
            return cap
    except Exception:
        pass
    return 64 << 20  # conservative (v7x-sized) fallback


_VMEM_BYTES = max(_vmem_capacity_bytes(), 32 << 20)
# ~VMEM/10 per block (4 pipeline buffers + f32 temporaries fit in < 3/4 VMEM):
#   v7x (64 MiB)  -> ~6.4 MiB blocks,   v5e/v6e (128 MiB) -> 8 MiB blocks.
_TARGET_BLOCK_BYTES = int(min(8 << 20, max(2 << 20, _VMEM_BYTES // 10)))


def _compiler_params(semantics, block_bytes, num_bufs=6):
    params = {"dimension_semantics": tuple(semantics)}
    need = num_bufs * block_bytes + (4 << 20)
    cap = (3 * _VMEM_BYTES) // 4
    if need > (12 << 20):  # only raise above the smallest (v5e) scoped default
        params["vmem_limit_bytes"] = int(min(need, cap))
    return pltpu.CompilerParams(**params)


def _reduce_sum(v, axes):
    # Chain of single-axis reductions (always supported by Mosaic).
    for ax in sorted(axes, reverse=True):
        v = jnp.sum(v, axis=ax, keepdims=True)
    return v


# ----------------------------------------------------------------------------
# Kernels
# ----------------------------------------------------------------------------
def _block_norm_kernel(x_ref, o_ref, *, red_axes, n_reduce, target_mean,
                       target_std, eps):
    """Normalize over `red_axes` of the block (stats fully contained in-block).

    Centered two-pass variance: the whole reduce extent is VMEM-resident, so
    the extra subtract/square costs nothing at the HBM roofline and avoids the
    E[x^2]-E[x]^2 cancellation problem.
    """
    x = x_ref[...].astype(jnp.float32)
    s = _reduce_sum(x, red_axes)
    x_mean = s * jnp.float32(1.0 / n_reduce)
    d = x - x_mean
    var = _reduce_sum(d * d, red_axes) * jnp.float32(1.0 / max(n_reduce - 1, 1))
    x_std = jnp.sqrt(var)

    t_std = x_std if target_std is None else jnp.float32(target_std)
    denom = x_std + jnp.float32(eps)
    inv = pl.reciprocal(denom, approx=True)   # EUP slot (per-row only)
    inv = inv * (2.0 - denom * inv)           # one Newton step -> ~f32 exact
    scale = t_std * inv

    if target_mean is None:
        out = d * scale + x_mean
    else:
        out = d * scale + jnp.float32(target_mean)
    o_ref[...] = out.astype(o_ref.dtype)


def _global_stats_kernel(x_ref, sb_ref, acc_ref, *, target_mean, target_std,
                         eps, n_reduce, tile_r, n_valid, mask_tail):
    """Streaming dim=None pass 1: accumulate per-lane sum / sum-of-squares over
    an 'arbitrary' grid axis; the last step fuses the scalar finalize and
    writes a (2, 128) scale/bias slab (no host-side glue ops)."""
    i = pl.program_id(0)
    last = pl.num_programs(0) - 1

    @pl.when(i == 0)
    def _():
        acc_ref[...] = jnp.zeros_like(acc_ref)

    x = x_ref[...].astype(jnp.float32)
    cols = x.shape[1]

    def _accum(xv):
        acc_ref[0:1, :] += jnp.sum(xv, axis=0, keepdims=True)
        acc_ref[1:2, :] += jnp.sum(xv * xv, axis=0, keepdims=True)

    if mask_tail:
        # Only the final partial block pays the iota/select masking cost.
        @pl.when(i < last)
        def _():
            _accum(x)

        @pl.when(i == last)
        def _():
            row = lax.broadcasted_iota(jnp.int32, x.shape, 0)
            col = lax.broadcasted_iota(jnp.int32, x.shape, 1)
            flat = (i * tile_r + row) * cols + col
            _accum(jnp.where(flat < n_valid, x, 0.0))
    else:
        _accum(x)

    @pl.when(i == last)
    def _finalize():
        s = jnp.sum(acc_ref[0:1, :], axis=1, keepdims=True)    # (1, 1)
        sq = jnp.sum(acc_ref[1:2, :], axis=1, keepdims=True)   # (1, 1)
        x_mean = s * jnp.float32(1.0 / n_reduce)
        var = jnp.maximum(sq - s * x_mean, 0.0) * jnp.float32(
            1.0 / max(n_reduce - 1, 1))
        x_std = jnp.sqrt(var)
        t_mean = x_mean if target_mean is None else jnp.float32(target_mean)
        t_std = x_std if target_std is None else jnp.float32(target_std)
        scale = t_std / (x_std + jnp.float32(eps))
        bias = t_mean - x_mean * scale
        sb_ref[0:1, :] = jnp.broadcast_to(scale, (1, _LANES))
        sb_ref[1:2, :] = jnp.broadcast_to(bias, (1, _LANES))


def _apply_scale_bias_kernel(sb_ref, x_ref, o_ref):
    """Streaming dim=None pass 2: out = x * scale + bias."""
    scale = sb_ref[0:1, 0:1]
    bias = sb_ref[1:2, 0:1]
    x = x_ref[...].astype(jnp.float32)
    o_ref[...] = (x * scale + bias).astype(o_ref.dtype)


# ----------------------------------------------------------------------------
# Wrappers
# ----------------------------------------------------------------------------
def _rowwise_normalize(x2d, mean, std, eps):
    """Stats over the trailing axis of a (rows, cols) view."""
    rows, cols = x2d.shape
    itemsize = jnp.dtype(x2d.dtype).itemsize
    row_bytes = max(cols * itemsize, 1)

    tile_r = max(1, _TARGET_BLOCK_BYTES // row_bytes)
    if tile_r >= rows:
        tile_r = rows
    else:
        tile_r = min(rows, max(8, (tile_r // 8) * 8))
    # TODO(synk): a single row larger than the VMEM budget still becomes one
    # (oversized) block; a column-tiled two-pass reduction would be needed.

    if cols % _LANES == 0 and cols >= _LANES:
        # Lane-dense: reduce extent spread over (sublanes, 128 lanes).
        sub = cols // _LANES
        xr = x2d.reshape(rows, sub, _LANES)
        block = (tile_r, sub, _LANES)
        index_map = lambda i: (i, 0, 0)
        red_axes = (1, 2)
    else:
        # TODO(synk): reduce extents that are small / not a multiple of 128
        # keep the natural layout and pay masked partial stores.
        xr = x2d
        block = (tile_r, cols)
        index_map = lambda i: (i, 0)
        red_axes = (1,)

    block_bytes = math.prod(block) * itemsize
    kernel = functools.partial(
        _block_norm_kernel, red_axes=red_axes, n_reduce=cols,
        target_mean=mean, target_std=std, eps=eps)

    out = pl.pallas_call(
        kernel,
        out_shape=jax.ShapeDtypeStruct(xr.shape, x2d.dtype),
        grid=(pl.cdiv(rows, tile_r),),
        in_specs=[pl.BlockSpec(block, index_map)],
        out_specs=pl.BlockSpec(block, index_map),
        compiler_params=_compiler_params(("parallel",), block_bytes),
    )(xr)
    return out.reshape(rows, cols)


def _interior_normalize(x3d, mean, std, eps):
    """Stats over the interior axis of a (lead, reduce, trail) view.

    No wrapper transpose: the trailing (lane) axis stays intact, so stores are
    lane-dense and HBM is touched exactly once in, once out.
    """
    lead, red, trail = x3d.shape
    itemsize = jnp.dtype(x3d.dtype).itemsize
    slice_bytes = red * trail * itemsize

    tile_l = min(lead, max(1, _TARGET_BLOCK_BYTES // max(slice_bytes, 1)))
    tile_t = trail
    if slice_bytes > _TARGET_BLOCK_BYTES and trail % _LANES == 0 and trail > _LANES:
        max_t = max(_LANES,
                    (_TARGET_BLOCK_BYTES // (red * itemsize)) // _LANES * _LANES)
        tile_t = min(trail, max_t)
    # TODO(synk): a single (reduce, trail-tile) slab larger than VMEM would
    # need per-column accumulators / a two-pass reduction over the reduce axis.

    block = (tile_l, red, tile_t)
    block_bytes = math.prod(block) * itemsize
    grid = (pl.cdiv(lead, tile_l), pl.cdiv(trail, tile_t))
    kernel = functools.partial(
        _block_norm_kernel, red_axes=(1,), n_reduce=red,
        target_mean=mean, target_std=std, eps=eps)

    return pl.pallas_call(
        kernel,
        out_shape=jax.ShapeDtypeStruct(x3d.shape, x3d.dtype),
        grid=grid,
        in_specs=[pl.BlockSpec(block, lambda i, j: (i, 0, j))],
        out_specs=pl.BlockSpec(block, lambda i, j: (i, 0, j)),
        compiler_params=_compiler_params(("parallel", "parallel"), block_bytes),
    )(x3d)


def _global_normalize_fused(x, n, mean, std, eps):
    """dim=None, tensor fits in VMEM: one pallas_call (2N HBM bytes total)."""
    orig_shape = x.shape
    if n % _LANES == 0 and n >= _LANES:
        view = x.reshape(n // _LANES, _LANES)       # fully lane-dense
    elif x.ndim >= 2:
        view = x.reshape(-1, orig_shape[-1])
    else:
        view = x.reshape(1, max(n, 1))
    R, C = view.shape
    block_bytes = R * C * jnp.dtype(x.dtype).itemsize
    kernel = functools.partial(
        _block_norm_kernel, red_axes=(0, 1), n_reduce=n,
        target_mean=mean, target_std=std, eps=eps)

    out = pl.pallas_call(
        kernel,
        out_shape=jax.ShapeDtypeStruct((R, C), x.dtype),
        grid=(1,),
        in_specs=[pl.BlockSpec((R, C), lambda i: (0, 0))],
        out_specs=pl.BlockSpec((R, C), lambda i: (0, 0)),
        compiler_params=_compiler_params(("arbitrary",), block_bytes, num_bufs=8),
    )(view)
    return out.reshape(orig_shape)


def _global_normalize_streaming(x, n, mean, std, eps, tile_rows=None):
    """dim=None, large tensor: tiled stats pass (+ fused in-kernel finalize)
    followed by a tiled scale/bias pass.  No jnp.pad / output slicing."""
    orig_shape = x.shape
    out_dtype = x.dtype
    itemsize = jnp.dtype(out_dtype).itemsize

    padded = False
    if n % _LANES == 0:
        view = x.reshape(n // _LANES, _LANES)       # lane-dense, no data move
    elif x.ndim >= 2:
        view = x.reshape(-1, orig_shape[-1])        # natural layout, no pad
    else:
        # TODO(synk): huge ragged 1-D input: pay a one-off pad pass (rare).
        m = pl.cdiv(n, _LANES)
        view = jnp.pad(x.reshape(-1), (0, m * _LANES - n)).reshape(m, _LANES)
        padded = True

    R, C = view.shape
    row_bytes = max(C * itemsize, 1)
    if tile_rows is not None:
        tile_r = min(int(tile_rows), R)
    else:
        tile_r = max(1, _TARGET_BLOCK_BYTES // row_bytes)
        tile_r = R if tile_r >= R else min(R, max(8, (tile_r // 8) * 8))

    grid = (pl.cdiv(R, tile_r),)
    block = (tile_r, C)
    block_bytes = tile_r * C * itemsize
    mask_tail = (R % tile_r != 0) or padded

    stats_kernel = functools.partial(
        _global_stats_kernel, target_mean=mean, target_std=std, eps=eps,
        n_reduce=n, tile_r=tile_r, n_valid=n, mask_tail=mask_tail)

    # Pass 1: per-lane partial sums (arbitrary axis) + fused scalar finalize.
    sb = pl.pallas_call(
        stats_kernel,
        out_shape=jax.ShapeDtypeStruct((2, _LANES), jnp.float32),
        grid=grid,
        in_specs=[pl.BlockSpec(block, lambda i: (i, 0))],
        out_specs=pl.BlockSpec((2, _LANES), lambda i: (0, 0)),
        scratch_shapes=[pltpu.VMEM((2, C), jnp.float32)],
        compiler_params=_compiler_params(("arbitrary",), block_bytes, num_bufs=3),
    )(view)

    # Pass 2: fused scale/bias, row-parallel.
    out_view = pl.pallas_call(
        _apply_scale_bias_kernel,
        out_shape=jax.ShapeDtypeStruct((R, C), out_dtype),
        grid=grid,
        in_specs=[pl.BlockSpec((2, _LANES), lambda i: (0, 0)),
                  pl.BlockSpec(block, lambda i: (i, 0))],
        out_specs=pl.BlockSpec(block, lambda i: (i, 0)),
        compiler_params=_compiler_params(("parallel",), block_bytes, num_bufs=5),
    )(sb, view)

    if padded:
        out_view = out_view.reshape(-1)[:n]
    return out_view.reshape(orig_shape)


def _global_normalize(x, n, mean, std, eps):
    itemsize = jnp.dtype(x.dtype).itemsize
    # Rough VMEM need of the fused path: in/out buffers + f32 temporaries.
    if n * (itemsize + 4) * 5 <= _VMEM_BYTES:
        return _global_normalize_fused(x, n, mean, std, eps)
    return _global_normalize_streaming(x, n, mean, std, eps)


def normalize(x, mean=None, std=None, dim=None, eps=1e-12):
    """Pallas-backed equivalent of Normalize(mean, std, dim, eps).forward(x)."""
    orig_shape = x.shape
    n_total = math.prod(orig_shape) if orig_shape else 1

    if dim is None:
        return _global_normalize(x, n_total, mean, std, eps)

    dims = (dim,) if isinstance(dim, int) else tuple(dim)
    dims = tuple(sorted({d % x.ndim for d in dims}))
    keep = tuple(d for d in range(x.ndim) if d not in dims)
    if not keep:  # reducing every axis == dim=None
        return _global_normalize(x, n_total, mean, std, eps)

    contiguous = dims == tuple(range(dims[0], dims[-1] + 1))
    if contiguous:
        d0, d1 = dims[0], dims[-1]
        lead = math.prod(orig_shape[:d0]) if d0 > 0 else 1
        red = math.prod(orig_shape[d0:d1 + 1])
        trail = math.prod(orig_shape[d1 + 1:]) if d1 + 1 < x.ndim else 1
        if trail == 1:
            out2d = _rowwise_normalize(x.reshape(lead, red), mean, std, eps)
            return out2d.reshape(orig_shape)
        out3d = _interior_normalize(x.reshape(lead, red, trail), mean, std, eps)
        return out3d.reshape(orig_shape)

    # Non-contiguous reduce dims (rare): transpose so they are trailing.
    perm = keep + dims
    xt = jnp.transpose(x, perm)
    rows = math.prod(orig_shape[d] for d in keep)
    cols = math.prod(orig_shape[d] for d in dims)
    out2d = _rowwise_normalize(xt.reshape(rows, cols), mean, std, eps)
    out = out2d.reshape(tuple(orig_shape[d] for d in perm))
    inv = [0] * x.ndim
    for i, p in enumerate(perm):
        inv[p] = i
    return jnp.transpose(out, inv)


# ----------------------------------------------------------------------------
# Pure-JAX reference (mirrors the PyTorch forward: unbiased std)
# ----------------------------------------------------------------------------
def _reference(x, mean=None, std=None, dim=None, eps=1e-12):
    x = x.astype(jnp.float32)
    if dim is None:
        axes = tuple(range(x.ndim))
    else:
        d = (dim,) if isinstance(dim, int) else tuple(dim)
        axes = tuple(a % x.ndim for a in d)
    x_mean = jnp.mean(x, axis=axes, keepdims=True)
    n = math.prod(x.shape[a] for a in axes)
    x_std = jnp.sqrt(jnp.sum((x - x_mean) ** 2, axis=axes, keepdims=True)
                     / max(n - 1, 1))
    t_mean = x_mean if mean is None else mean
    t_std = x_std if std is None else std
    return t_std * (x - x_mean) / (x_std + eps) + t_mean


if __name__ == "__main__":
    key = jax.random.PRNGKey(0)
    x = jax.random.normal(key, (2, 4, 16, 16), dtype=jnp.float32) * 3.0 + 1.5

    # 1. Per-sample normalization to fixed targets (trailing dims, lane-dense).
    out1 = jax.block_until_ready(normalize(x, mean=0.0, std=1.0, dim=(1, 2, 3)))
    ref1 = _reference(x, mean=0.0, std=1.0, dim=(1, 2, 3))
    assert out1.shape == x.shape
    assert jnp.allclose(out1, ref1, atol=1e-4, rtol=1e-4)

    # 2. Default Normalize(): global stats -> fused single-pass kernel.
    out2 = jax.block_until_ready(normalize(x))
    ref2 = _reference(x)
    assert jnp.allclose(out2, ref2, atol=1e-4, rtol=1e-4)

    # 3. Per-(sample, channel) stats with data-derived targets.
    out3 = jax.block_until_ready(normalize(x, dim=(2, 3)))
    ref3 = _reference(x, dim=(2, 3))
    assert jnp.allclose(out3, ref3, atol=1e-4, rtol=1e-4)

    # 4. Interior reduce axis (dim=1): no wrapper transpose, 3-D block.
    out4 = jax.block_until_ready(normalize(x, mean=0.5, std=2.0, dim=1))
    ref4 = _reference(x, mean=0.5, std=2.0, dim=1)
    assert jnp.allclose(out4, ref4, atol=1e-4, rtol=1e-4)

    # 5. Non-contiguous reduce dims -> transpose fallback path.
    out5 = jax.block_until_ready(normalize(x, dim=(0, 2)))
    ref5 = _reference(x, dim=(0, 2))
    assert jnp.allclose(out5, ref5, atol=1e-4, rtol=1e-4)

    # 6. Streaming dim=None path (forced small tiles to exercise the multi-step
    #    accumulation + in-kernel finalize + scale/bias apply kernels).
    x6 = jax.random.normal(jax.random.PRNGKey(1), (32, 128), jnp.float32) * 0.7 + 3.0
    out6 = jax.block_until_ready(
        _global_normalize_streaming(x6, x6.size, None, None, 1e-12, tile_rows=8))
    ref6 = _reference(x6)
    assert jnp.allclose(out6, ref6, atol=1e-4, rtol=1e-4)

    # 7. Streaming path with a ragged final block and a narrow trailing dim.
    x7 = jax.random.normal(jax.random.PRNGKey(2), (2, 3, 10, 10), jnp.float32) * 2.0 - 1.0
    out7 = jax.block_until_ready(
        _global_normalize_streaming(x7, x7.size, 0.0, 1.0, 1e-12, tile_rows=8))
    ref7 = _reference(x7, mean=0.0, std=1.0)
    assert jnp.allclose(out7, ref7, atol=1e-4, rtol=1e-4)

    print("KERNEL_OK")
</pallas_src>

<mosaic_0001>
module attributes {stable_mosaic.version = 11 : i64} {
  func.func @_block_norm_kernel(%arg0: i32, %arg1: memref<2x8x128xf32, #tpu.memory_space<vmem>>, %arg2: memref<2x8x128xf32, #tpu.memory_space<vmem>>) attributes {dimension_semantics = [#tpu.dimension_semantics<parallel>], iteration_bounds = array<i64: 1>, scalar_prefetch = 0 : i64, scratch_operands = 0 : i64, tpu.core_type = #tpu.core_type<tc>, window_params = [{transform_indices = @transform_0, window_bounds = array<i64: 2, 8, 128>}, {transform_indices = @transform_1, window_bounds = array<i64: 2, 8, 128>}]} {
    %c0 = arith.constant 0 : index
    %c0_0 = arith.constant 0 : index
    %c0_1 = arith.constant 0 : index
    %0 = vector.load %arg1[%c0, %c0_0, %c0_1] : memref<2x8x128xf32, #tpu.memory_space<vmem>>, vector<2x8x128xf32>
    %cst = arith.constant dense<0.000000e+00> : vector<2x8xf32>
    %1 = vector.multi_reduction <add>, %0, %cst [2] : vector<2x8x128xf32> to vector<2x8xf32>
    %2 = vector.shape_cast %1 : vector<2x8xf32> to vector<2x8x1xf32>
    %cst_2 = arith.constant dense<0.000000e+00> : vector<2x1xf32>
    %3 = vector.multi_reduction <add>, %2, %cst_2 [1] : vector<2x8x1xf32> to vector<2x1xf32>
    %4 = vector.shape_cast %3 : vector<2x1xf32> to vector<2x1x1xf32>
    %cst_3 = arith.constant 9.765625E-4 : f32
    %5 = vector.broadcast %cst_3 : f32 to vector<2x1x1xf32>
    %6 = arith.mulf %4, %5 : vector<2x1x1xf32>
    %7 = vector.broadcast %6 : vector<2x1x1xf32> to vector<2x8x128xf32>
    %8 = arith.subf %0, %7 : vector<2x8x128xf32>
    %9 = arith.mulf %8, %8 : vector<2x8x128xf32>
    %cst_4 = arith.constant dense<0.000000e+00> : vector<2x8xf32>
    %10 = vector.multi_reduction <add>, %9, %cst_4 [2] : vector<2x8x128xf32> to vector<2x8xf32>
    %11 = vector.shape_cast %10 : vector<2x8xf32> to vector<2x8x1xf32>
    %cst_5 = arith.constant dense<0.000000e+00> : vector<2x1xf32>
    %12 = vector.multi_reduction <add>, %11, %cst_5 [1] : vector<2x8x1xf32> to vector<2x1xf32>
    %13 = vector.shape_cast %12 : vector<2x1xf32> to vector<2x1x1xf32>
    %cst_6 = arith.constant 9.77517105E-4 : f32
    %14 = vector.broadcast %cst_6 : f32 to vector<2x1x1xf32>
    %15 = arith.mulf %13, %14 : vector<2x1x1xf32>
    %16 = math.sqrt %15 : vector<2x1x1xf32>
    %cst_7 = arith.constant 9.99999996E-13 : f32
    %17 = vector.broadcast %cst_7 : f32 to vector<2x1x1xf32>
    %18 = arith.addf %16, %17 : vector<2x1x1xf32>
    %19 = tpu.reciprocal %18 {approx = true} : vector<2x1x1xf32> -> vector<2x1x1xf32>
    %20 = arith.mulf %18, %19 : vector<2x1x1xf32>
    %cst_8 = arith.constant 2.000000e+00 : f32
    %21 = vector.broadcast %cst_8 : f32 to vector<2x1x1xf32>
    %22 = arith.subf %21, %20 : vector<2x1x1xf32>
    %23 = arith.mulf %19, %22 : vector<2x1x1xf32>
    %cst_9 = arith.constant 1.000000e+00 : f32
    %24 = vector.broadcast %cst_9 : f32 to vector<2x1x1xf32>
    %25 = arith.mulf %24, %23 : vector<2x1x1xf32>
    %26 = vector.broadcast %25 : vector<2x1x1xf32> to vector<2x8x128xf32>
    %27 = arith.mulf %8, %26 : vector<2x8x128xf32>
    %cst_10 = arith.constant 0.000000e+00 : f32
    %28 = vector.broadcast %cst_10 : f32 to vector<2x8x128xf32>
    %29 = arith.addf %27, %28 : vector<2x8x128xf32>
    %c0_11 = arith.constant 0 : index
    %c0_12 = arith.constant 0 : index
    %c0_13 = arith.constant 0 : index
    %30 = vector.load %arg2[%c0_11, %c0_12, %c0_13] : memref<2x8x128xf32, #tpu.memory_space<vmem>>, vector<2x8x128xf32>
    tpu.vector_store %arg2[%c0_11, %c0_12, %c0_13], %29 {strides = array<i32>} : memref<2x8x128xf32, #tpu.memory_space<vmem>>, vector<2x8x128xf32>,
    return
  }
  func.func @transform_0(%arg0: i32) -> (i32, i32, i32) {
    %c0_i32 = arith.constant 0 : i32
    %c0_i32_0 = arith.constant 0 : i32
    %c0_i32_1 = arith.constant 0 : i32
    return %arg0, %c0_i32, %c0_i32_0 : i32, i32, i32
  }
  func.func @transform_1(%arg0: i32) -> (i32, i32, i32) {
    %c0_i32 = arith.constant 0 : i32
    %c0_i32_0 = arith.constant 0 : i32
    %c0_i32_1 = arith.constant 0 : i32
    return %arg0, %c0_i32, %c0_i32_0 : i32, i32, i32
  }
}

</mosaic_0001>

<bundles_post_ra>
// kernel: tpu_custom_call.1
= control target key start
LH: loop header
LB: loop body
LE: loop exit
PB: predicated region body
PF: predicated region fallthrough
CT: control target
= control target key end

     0   :  { %6 = vsyncpa [#allocation3], 0  ;;  %s216_s0 = inlined_call_operand.hbm [shape: f32[2,8,128], index: 0, kind: input, shape index: {}]   ;;  %s217_s1 = inlined_call_operand.hbm [shape: f32[2,8,128], index: 1, kind: output, shape index: {}]  }
   0x1   :  { %7 = vsyncpa [#allocation4], 0  ;;  %s172_s6 = smov [#allocation2]   ;;  %s124_s10 = scalar_lea.hbm %s216_s0, 256 }
   0x2   :  { %s13_s7 = sshll.u32 %s172_s6, 4  ;;  %p125_p0 = scmp.ne.s32.totalorder %s216_s0, %s124_s10  ;;  %s14_s7 = int_to_ptr.vmem [resolvable:$true] %s13_s7 }
   0x3   :  { %p128_p1 = scmp.lt.u32.totalorder %s124_s10, %s216_s0 }
   0x5   :  { %p130_p2 = pnand %p128_p1, %p125_p0 }
   0x7   :  { %133 = shalt.err (!%p130_p2)
}
   0x8   :  { %s134_s15 = scalar_lea.vmem %s14_s7, 256  ;;  %p139_p4 = scmp.lt.s32.totalorder %s14_s7, %s14_s7 }
   0x9   :  { %p135_p3 = scmp.ne.s32.totalorder %s14_s7, %s134_s15  ;;  %p140_p5 = scmp.lt.s32.totalorder %s134_s15, %s134_s15 }
   0xb   :  { %p141_p6 = por %p140_p5, %p139_p4 }
   0xd   :  { %p142_p7 = pnand %p141_p6, %p135_p3 }
   0xf   :  { %145 = shalt.err (!%p142_p7)
}
  0x10   :  { %s173_s16 = smov 128   ;;  %s174_s17 = smov 8  }
  0x11   :  { %19 = dma.hbm_to_vmem [thread:$0]  %s216_s0, 256, %s14_s7, [#allocation3], %s173_s16, %s173_s16, %s174_s17  }
  0x12   :  { %168 = dma.done.wait [#allocation3], 256  }
  0x13   :  { %169 = vsyncadd [#allocation3], 4294967040  ;;  %v23_v0 = vld [vmem:[#allocation2] sm:$0xff]  ;;  %v24_v1 = vld [vmem:[#allocation2 + $0x8] sm:$0xff]  ;;  %s175_s0 = smov [#allocation5]  }
  0x14   :  { %25 = vadd.xlane.f32.xlu0 %v23_v0  ;;  %s100_s20 = sshll.u32 %s175_s0, 4  ;;  %s101_s20 = int_to_ptr.vmem [resolvable:$true] %s100_s20 }
  0x15   :  { %s146_s21 = scalar_lea.vmem %s101_s20, 256  ;;  %p151_p9 = scmp.lt.s32.totalorder %s101_s20, %s101_s20 }
  0x16   :  { %p147_p8 = scmp.ne.s32.totalorder %s101_s20, %s146_s21  ;;  %p152_p10 = scmp.lt.s32.totalorder %s146_s21, %s146_s21 }
  0x18   :  { %27 = vadd.xlane.f32.xlu0 %v24_v1  ;;  %p153_p11 = por %p152_p10, %p151_p9 }
  0x1a   :  { %p154_p12 = pnand %p153_p11, %p147_p8 }
  0xa1   :  { %v26_v2 = vpop.xlane.xlu0 %25 }
  0xa2   :  { %v29_v3 = vrot.slane %v26_v2, 4 }
  0xa4   :  { %v30_v4 = vadd.f32 %v29_v3, %v26_v2 }
  0xa5   :  { %v28_v5 = vpop.xlane.xlu0 %27 }
  0xa6   :  { %v31_v6 = vrot.slane %v30_v4, 2  ;;  %v35_v7 = vrot.slane %v28_v5, 4 }
  0xa8   :  { %v32_v8 = vadd.f32 %v31_v6, %v30_v4  ;;  %v36_v9 = vadd.f32 %v35_v7, %v28_v5 }
  0xaa   :  { %v33_v10 = vrot.slane %v32_v8, 1  ;;  %v37_v11 = vrot.slane %v36_v9, 2 }
  0xac   :  { %v38_v12 = vadd.f32 %v37_v11, %v36_v9  ;;  %v34_v13 = vadd.f32 %v33_v10, %v32_v8 }
  0xae   :  { %v39_v14 = vrot.slane %v38_v12, 1  ;;  %v41_v15 = vmul.f32 0.0009765625, %v34_v13 }
  0xb0   :  { %v40_v16 = vadd.f32 %v39_v14, %v38_v12  ;;  %v43_v17 = vsub.f32 %v23_v0, %v41_v15 }
  0xb2   :  { %v42_v18 = vmul.f32 0.0009765625, %v40_v16  ;;  %v45_v19 = vmul.f32 %v43_v17, %v43_v17 }
  0xb4   :  { %47 = vadd.xlane.f32.xlu1 %v45_v19  ;;  %v44_v20 = vsub.f32 %v24_v1, %v42_v18 }
  0xb6   :  { %v46_v21 = vmul.f32 %v44_v20, %v44_v20 }
  0xb8   :  { %49 = vadd.xlane.f32.xlu1 %v46_v21 }
 0x141   :  { %v48_v22 = vpop.xlane.xlu1 %47 }
 0x142   :  { %v51_v23 = vrot.slane %v48_v22, 4 }
 0x144   :  { %v52_v24 = vadd.f32 %v51_v23, %v48_v22 }
 0x145   :  { %v50_v25 = vpop.xlane.xlu1 %49 }
 0x146   :  { %v53_v26 = vrot.slane %v52_v24, 2  ;;  %v57_v27 = vrot.slane %v50_v25, 4 }
 0x148   :  { %v54_v28 = vadd.f32 %v53_v26, %v52_v24  ;;  %v58_v29 = vadd.f32 %v57_v27, %v50_v25 }
 0x14a   :  { %v55_v30 = vrot.slane %v54_v28, 1  ;;  %v59_v31 = vrot.slane %v58_v29, 2 }
 0x14c   :  { %v56_v32 = vadd.f32 %v55_v30, %v54_v28  ;;  %v60_v33 = vadd.f32 %v59_v31, %v58_v29 }
 0x14e   :  { %v63_v34 = vmul.f32 0.0009775171, %v56_v32  ;;  %v61_v35 = vrot.slane %v60_v33, 1 }
 0x150   :  { %116 = vrsqrt.f32 %v63_v34  ;;  %v62_v36 = vadd.f32 %v61_v35, %v60_v33  ;;  %vm67_vm0 = vcmp.eq.f32.partialorder %v63_v34, inf  ;;  %v70_v40 = vand.u32 2147483648, %v63_v34 }
 0x151   :  { %vm69_vm1 = vcmp.eq.f32.partialorder %v63_v34, 0.0 }
 0x152   :  { %v64_v37 = vmul.f32 0.0009775171, %v62_v36 }
 0x154   :  { %118 = vrsqrt.f32 %v64_v37  ;;  %vm74_vm2 = vcmp.eq.f32.partialorder %v64_v37, inf  ;;  %v77_v46 = vand.u32 2147483648, %v64_v37  ;;  %vm76_vm3 = vcmp.eq.f32.partialorder %v64_v37, 0.0 }
 0x15a   :  { %v117_v38 = vpop.eup %116 }
 0x15b   :  { %v66_v39 = vmul.f32 %v117_v38, %v63_v34 }
 0x15d   :  { %v68_v41 = vsel %vm67_vm0, %v63_v34, %v66_v39 }
 0x15e   :  { %v119_v42 = vpop.eup %118  ;;  %v71_v43 = vsel %vm69_vm1, %v70_v40, %v68_v41 }
 0x15f   :  { %v73_v44 = vmul.f32 %v119_v42, %v64_v37  ;;  %v79_v45 = vadd.f32 1e-12, %v71_v43 }
 0x161   :  { %v75_v47 = vsel %vm74_vm2, %v64_v37, %v73_v44  ;;  %120 = vrcp.f32 %v79_v45 }
 0x162   :  { %v78_v48 = vsel %vm76_vm3, %v77_v46, %v75_v47 }
 0x163   :  { %v80_v49 = vadd.f32 1e-12, %v78_v48 }
 0x165   :  { %122 = vrcp.f32 %v80_v49 }
 0x16b   :  { %v121_v50 = vpop.eup %120 }
 0x16c   :  { %v83_v51 = vmul.f32 %v121_v50, %v79_v45 }
 0x16e   :  { %v85_v52 = vsub.f32 2.0, %v83_v51 }
 0x16f   :  { %v123_v53 = vpop.eup %122 }
 0x170   :  { %v84_v54 = vmul.f32 %v123_v53, %v80_v49  ;;  %v87_v55 = vmul.f32 %v121_v50, %v85_v52 }
 0x172   :  { %v86_v56 = vsub.f32 2.0, %v84_v54  ;;  %v89_v57 = vmul.f32 %v87_v55, %v43_v17 }
 0x174   :  { %v88_v58 = vmul.f32 %v123_v53, %v86_v56  ;;  %93 = vst [vmem:[#allocation5] sm:$0xff] %v89_v57 }
 0x176   :  { %v90_v59 = vmul.f32 %v88_v58, %v44_v20 }
 0x178   :  { %94 = vst [vmem:[#allocation5 + $0x8] sm:$0xff] %v90_v59 }
 0x179   :  { %157 = shalt.err (!%p154_p12)
}
 0x17a   :  { %s158_s24 = scalar_lea.hbm %s217_s1, 256 }
 0x17b   :  { %p159_p13 = scmp.ne.s32.totalorder %s217_s1, %s158_s24  ;;  %p162_p0 = scmp.lt.u32.totalorder %s158_s24, %s217_s1 }
 0x17d   :  { %p164_p1 = pnand %p162_p0, %p159_p13 }
 0x17f   :  { %167 = shalt.err (!%p164_p1)
}
 0x180   :  { %106 = dma.vmem_to_hbm [thread:$0]  %s101_s20, 256, %s217_s1, [#allocation4], %s173_s16, %s173_s16, %s174_s17  }
 0x181   :  { %170 = dma.done.wait [#allocation4], 256  }
 0x182   :  { %171 = vsyncadd [#allocation4], 4294967040 }
 0x183   :  { %110 = vsyncpa [#allocation3], 1 }
 0x184   :  { %111 = vsyncpa [#allocation4], 1 }

</bundles_post_ra>
